<compile_context>
chip_gen: v7x
topology: tpu7x:2x2x1
jax: 0.10.0
libtpu: 0.0.40
codegen_flags: <defaults>
</compile_context>

<pallas_src>
import functools
import numpy as np
import jax
import jax.numpy as jnp
from jax.experimental import pallas as pl
from jax.experimental.pallas import tpu as pltpu


LANE = 128
_VMEM_BUDGET = 40 * 1024 * 1024       # tile-planning budget (fits v7x's 64 MiB)
_VMEM_LIMIT = 48 * 1024 * 1024        # scoped VMEM limit handed to Mosaic


def _round_up(x, m):
    return ((x + m - 1) // m) * m


def _pad2d(x, rows, cols, dtype):
    out = jnp.zeros((rows, cols), dtype)
    return out.at[: x.shape[0], : x.shape[1]].set(x.astype(dtype))


# ---------------------------------------------------------------------------
# t == 0 : hist = M @ one_hot(deg_full)   (pure MXU matmul, accumulate over k)
# ---------------------------------------------------------------------------
def _hist_full_kernel(m_ref, oh_ref, o_ref):
    k = pl.program_id(1)

    @pl.when(k == 0)
    def _():
        o_ref[...] = jnp.zeros_like(o_ref)

    o_ref[...] += jnp.dot(m_ref[...], oh_ref[...],
                          preferred_element_type=jnp.float32)


# ---------------------------------------------------------------------------
# t != 0 : deg_sub = M @ A (accumulated over k), then masked degree histogram
#          folded into the resident [tp, out_pad] output once per j-slab.
#          M arrives as a resident per-i row slab [tp, N_pad]; the matmul LHS
#          (k-view) and the membership mask (j-view) are sliced from it.
# ---------------------------------------------------------------------------
def _hist_sub_kernel(m_ref, a_ref, o_ref, acc_ref, *, out_dim, tn):
    j = pl.program_id(1)
    k = pl.program_id(2)
    nk = pl.num_programs(2)

    # Zero the resident histogram output at the first (j, k) step of each i.
    @pl.when(jnp.logical_and(j == 0, k == 0))
    def _():
        o_ref[...] = jnp.zeros_like(o_ref)

    # Zero the degree accumulator at the start of each k-reduction.
    @pl.when(k == 0)
    def _():
        acc_ref[...] = jnp.zeros_like(acc_ref)

    # deg_sub[p, n] = sum_k M[p, k] * A[k, n]   (A symmetric)  -> MXU.
    lhs = m_ref[:, pl.ds(pl.multiple_of(k * tn, LANE), tn)]
    acc_ref[...] += jnp.dot(lhs, a_ref[...],
                            preferred_element_type=jnp.float32)

    # Once the degrees for this j-slab are complete, fold them into the hist.
    @pl.when(k == nk - 1)
    def _():
        tp = o_ref.shape[0]
        out_pad = o_ref.shape[1]
        n_chunks = tn // LANE

        # Per-bucket counts, accumulated over 128-lane chunks so the live
        # compare/select intermediates stay bounded (no VMEM spills at big tn).
        cols = [jnp.zeros((tp, 1), jnp.float32) for _ in range(out_dim)]
        for c in range(n_chunks):
            mask = m_ref[:, pl.ds(pl.multiple_of(j * tn + c * LANE, LANE),
                                  LANE)].astype(jnp.float32)       # [tp,128] 0/1
            deg = acc_ref[:, c * LANE:(c + 1) * LANE]               # exact ints
            # Non-members get sentinel `out_dim`, which never matches a bucket.
            md = deg * mask + (1.0 - mask) * jnp.float32(out_dim)
            for d in range(out_dim):                 # out_dim is small / static
                cols[d] = cols[d] + jnp.sum(
                    (md == jnp.float32(d)).astype(jnp.float32),
                    axis=1, keepdims=True)

        lane = jax.lax.broadcasted_iota(jnp.int32, (tp, out_pad), 1)
        contrib = jnp.zeros((tp, out_pad), jnp.float32)
        for d in range(out_dim):
            contrib = contrib + jnp.where(lane == d, cols[d], 0.0)
        o_ref[...] += contrib


# ---------------------------------------------------------------------------
# Tile planning
# ---------------------------------------------------------------------------
def _base_tiles(P, tp_req, N, tn_req):
    tn_eff = tn_req if N > tn_req else _round_up(max(N, 1), LANE)
    tp_eff = tp_req if P > tp_req else _round_up(max(P, 1), LANE)
    # Keep >= 2 i-steps when P allows it so the "parallel" axis can split
    # across v7x's two TensorCores (harmless on 1-TC chips).
    if P > LANE:
        tp_eff = min(tp_eff, _round_up((P + 1) // 2, LANE))
    return tp_eff, tn_eff


def _tile_plan_sub(P, N, tp_req, tn_req, out_pad):
    tp_eff, tn_eff = _base_tiles(P, tp_req, N, tn_req)

    def footprint(tp, tn):
        n_pad = _round_up(N, tn)
        return (2 * tp * n_pad * 2        # double-buffered bf16 M row slab
                + 2 * tn * tn * 2         # double-buffered bf16 A tile
                + 2 * tp * out_pad * 4    # resident histogram output
                + tp * tn * 4)            # f32 degree accumulator

    while tp_eff > LANE and footprint(tp_eff, tn_eff) > _VMEM_BUDGET:
        tp_eff -= LANE
    while tn_eff > LANE and footprint(tp_eff, tn_eff) > _VMEM_BUDGET:
        tn_eff -= LANE
    # TODO(synk): if even a (128, N_pad) bf16 slab overflows VMEM (N ~> 150k),
    #             fall back to streaming M in (tp, tn) tiles.
    return tp_eff, tn_eff, _round_up(P, tp_eff), _round_up(N, tn_eff)


def _tile_plan_full(P, N, tp_req, tn_req):
    # t == 0 is HBM-bound (AI ~ out_pad=128): prefer very wide N tiles.
    tp_eff, tn_eff = _base_tiles(P, tp_req, N, max(tn_req, 1024))
    return tp_eff, tn_eff, _round_up(P, tp_eff), _round_up(N, tn_eff)


# ---------------------------------------------------------------------------
# Wrapper
# ---------------------------------------------------------------------------
def hard_embedder_forward(t, membership, adj, out_dim, *, tp=512, tn=512):
    """membership: [P, N] 0/1, adj: [N, N] symmetric 0/1 (no self-loops).

    `t` must be a static Python int (level index): the branch is chosen at
    trace time so only the needed computation is compiled.
    Returns float32 [P, out_dim] degree histograms.
    """
    P, N = membership.shape
    assert adj.shape == (N, N)
    out_pad = _round_up(out_dim, LANE)        # lane-dense output, sliced below

    def _cparams(sem):
        return pltpu.CompilerParams(dimension_semantics=sem,
                                    vmem_limit_bytes=_VMEM_LIMIT)

    if t == 0:
        tp_eff, tn_eff, P_pad, N_pad = _tile_plan_full(P, N, tp, tn)
        m_bf = _pad2d(membership, P_pad, N_pad, jnp.bfloat16)

        # Glue (plain JAX): full-graph degrees -> one-hot. Degrees >= out_dim
        # land in sliced-off columns (or an all-zero row if >= out_pad), which
        # matches the reference's "drop degrees >= out_dim" behaviour.
        deg_full = jnp.sum(adj.astype(jnp.float32), axis=1).astype(jnp.int32)
        onehot = (deg_full[:, None]
                  == jnp.arange(out_pad, dtype=jnp.int32)[None, :])
        onehot = _pad2d(onehot, N_pad, out_pad, jnp.bfloat16)

        grid = (P_pad // tp_eff, N_pad // tn_eff)
        out = pl.pallas_call(
            _hist_full_kernel,
            out_shape=jax.ShapeDtypeStruct((P_pad, out_pad), jnp.float32),
            grid_spec=pltpu.PrefetchScalarGridSpec(
                num_scalar_prefetch=0,
                grid=grid,
                in_specs=[
                    pl.BlockSpec((tp_eff, tn_eff), lambda i, k: (i, k)),
                    pl.BlockSpec((tn_eff, out_pad), lambda i, k: (k, 0)),
                ],
                out_specs=pl.BlockSpec((tp_eff, out_pad), lambda i, k: (i, 0)),
            ),
            compiler_params=_cparams(("parallel", "arbitrary")),
            cost_estimate=pl.CostEstimate(
                flops=2 * P_pad * N_pad * out_pad,
                transcendentals=0,
                bytes_accessed=(P_pad * N_pad * 2                       # M once
                                + grid[0] * N_pad * out_pad * 2         # onehot per i
                                + P_pad * out_pad * 4)),                # out
        )(m_bf, onehot)
    else:
        tp_eff, tn_eff, P_pad, N_pad = _tile_plan_sub(P, N, tp, tn, out_pad)
        m_bf = _pad2d(membership, P_pad, N_pad, jnp.bfloat16)
        a_bf = _pad2d(adj, N_pad, N_pad, jnp.bfloat16)

        grid = (P_pad // tp_eff, N_pad // tn_eff, N_pad // tn_eff)  # (i, j, k)
        out = pl.pallas_call(
            functools.partial(_hist_sub_kernel, out_dim=out_dim, tn=tn_eff),
            out_shape=jax.ShapeDtypeStruct((P_pad, out_pad), jnp.float32),
            grid_spec=pltpu.PrefetchScalarGridSpec(
                num_scalar_prefetch=0,
                grid=grid,
                in_specs=[
                    # Resident per-i M row slab (changes only with i).
                    pl.BlockSpec((tp_eff, N_pad), lambda i, j, k: (i, 0)),
                    # A tile (matmul RHS), the dominant streaming input.
                    pl.BlockSpec((tn_eff, tn_eff), lambda i, j, k: (k, j)),
                ],
                out_specs=pl.BlockSpec((tp_eff, out_pad),
                                       lambda i, j, k: (i, 0)),
                scratch_shapes=[pltpu.VMEM((tp_eff, tn_eff), jnp.float32)],
            ),
            compiler_params=_cparams(("parallel", "arbitrary", "arbitrary")),
            cost_estimate=pl.CostEstimate(
                flops=2 * P_pad * N_pad * N_pad + 3 * P_pad * N_pad * out_dim,
                transcendentals=0,
                bytes_accessed=(P_pad * N_pad * 2                       # M slab once
                                + grid[0] * N_pad * N_pad * 2           # A per i-block
                                + P_pad * out_pad * 4)),                # out
        )(m_bf, a_bf)

    return out[:P, :out_dim]


# ---------------------------------------------------------------------------
# Pure-numpy reference mirroring the networkx / Counter code.
# ---------------------------------------------------------------------------
def _ref_forward(t, membership_np, adj_np, out_dim):
    P_, _ = membership_np.shape
    deg_full = adj_np.sum(axis=1)
    out = np.zeros((P_, out_dim), np.float32)
    for p in range(P_):
        nodes = np.nonzero(membership_np[p])[0]
        for j in nodes:
            if t == 0:
                d = int(deg_full[j])
            else:
                d = int(adj_np[np.ix_([j], nodes)].sum())
            if d < out_dim:
                out[p, d] += 1.0
    return out


if __name__ == "__main__":
    key = jax.random.PRNGKey(0)

    def build_case(case_key, N, P, E):
        k1, k2, k3 = jax.random.split(case_key, 3)
        src = jax.random.randint(k1, (E,), 0, N)
        dst = jax.random.randint(k2, (E,), 0, N)
        dst = jnp.where(src == dst, (dst + 1) % N, dst)       # no self-loops
        # Glue (plain JAX): dense symmetric adjacency of the initial graph.
        adj = jnp.zeros((N, N), jnp.float32)
        adj = adj.at[src, dst].set(1.0)
        adj = adj.at[dst, src].set(1.0)
        # spotlights[t] encoded as a dense membership matrix [P, N].
        membership = jax.random.bernoulli(k3, 0.5, (P, N)).astype(jnp.float32)
        return membership, adj

    cases = [
        # (N, P, E, out_dim, tile overrides)
        (16, 8, 24, 8, {}),                           # module-scale tiny case
        (300, 200, 450, 16, dict(tp=128, tn=128)),    # multi-tile grid exercise
    ]

    ok = True
    for idx, (N, P, E, OUT_DIM, tiles) in enumerate(cases):
        membership, adj = build_case(jax.random.fold_in(key, idx), N, P, E)
        m_np, a_np = np.array(membership), np.array(adj)
        for t in (0, 1):
            emb = hard_embedder_forward(t, membership, adj, OUT_DIM, **tiles)
            emb = np.array(jax.block_until_ready(emb))
            ref = _ref_forward(t, m_np, a_np, OUT_DIM)
            ok = ok and np.allclose(emb, ref)

    assert ok, "Pallas HardEmbedder does not match the reference"
    print("KERNEL_OK")
</pallas_src>

<mosaic_0001>
module attributes {stable_mosaic.version = 11 : i64} {
  func.func @_hist_full_kernel(%arg0: i32, %arg1: i32, %arg2: memref<128x128xbf16, #tpu.memory_space<vmem>>, %arg3: memref<128x128xbf16, #tpu.memory_space<vmem>>, %arg4: memref<128x128xf32, #tpu.memory_space<vmem>>) attributes {dimension_semantics = [#tpu.dimension_semantics<parallel>, #tpu.dimension_semantics<arbitrary>], iteration_bounds = array<i64: 1, 1>, scalar_prefetch = 0 : i64, scratch_operands = 0 : i64, tpu.core_type = #tpu.core_type<tc>, window_params = [{transform_indices = @transform_0, window_bounds = array<i64: 128, 128>}, {transform_indices = @transform_1, window_bounds = array<i64: 128, 128>}, {transform_indices = @transform_2, window_bounds = array<i64: 128, 128>}]} {
    %c0_i32 = arith.constant 0 : i32
    %0 = arith.cmpi eq, %arg1, %c0_i32 : i32
    %1 = arith.extui %0 : i1 to i32
    %c0_i32_0 = arith.constant 0 : i32
    %2 = arith.cmpi ne, %1, %c0_i32_0 : i32
    scf.if %2 {
      %cst_8 = arith.constant 0.000000e+00 : f32
      %9 = vector.broadcast %cst_8 : f32 to vector<128x128xf32>
      %c0_9 = arith.constant 0 : index
      %c0_10 = arith.constant 0 : index
      %10 = vector.load %arg4[%c0_9, %c0_10] : memref<128x128xf32, #tpu.memory_space<vmem>>, vector<128x128xf32>
      tpu.vector_store %arg4[%c0_9, %c0_10], %9 {strides = array<i32>} : memref<128x128xf32, #tpu.memory_space<vmem>>, vector<128x128xf32>,
    } else {
    }
    %c0 = arith.constant 0 : index
    %c0_1 = arith.constant 0 : index
    %3 = vector.load %arg4[%c0, %c0_1] : memref<128x128xf32, #tpu.memory_space<vmem>>, vector<128x128xf32>
    %c0_2 = arith.constant 0 : index
    %c0_3 = arith.constant 0 : index
    %4 = vector.load %arg2[%c0_2, %c0_3] : memref<128x128xbf16, #tpu.memory_space<vmem>>, vector<128x128xbf16>
    %c0_4 = arith.constant 0 : index
    %c0_5 = arith.constant 0 : index
    %5 = vector.load %arg3[%c0_4, %c0_5] : memref<128x128xbf16, #tpu.memory_space<vmem>>, vector<128x128xbf16>
    %cst = arith.constant dense<0.000000e+00> : vector<128x128xf32>
    %6 = tpu.matmul %4, %5, %cst {dimension_numbers = #tpu.dot_dimension_numbers<[1], [0], [0], [1], [0, 0, 1, 1], [], []>} : vector<128x128xbf16>, vector<128x128xbf16>, vector<128x128xf32> -> vector<128x128xf32>
    %7 = arith.addf %3, %6 : vector<128x128xf32>
    %c0_6 = arith.constant 0 : index
    %c0_7 = arith.constant 0 : index
    %8 = vector.load %arg4[%c0_6, %c0_7] : memref<128x128xf32, #tpu.memory_space<vmem>>, vector<128x128xf32>
    tpu.vector_store %arg4[%c0_6, %c0_7], %7 {strides = array<i32>} : memref<128x128xf32, #tpu.memory_space<vmem>>, vector<128x128xf32>,
    return
  }
  func.func @transform_0(%arg0: i32, %arg1: i32) -> (i32, i32) {
    %c0_i32 = arith.constant 0 : i32
    return %arg0, %arg1 : i32, i32
  }
  func.func @transform_1(%arg0: i32, %arg1: i32) -> (i32, i32) {
    %c0_i32 = arith.constant 0 : i32
    %c0_i32_0 = arith.constant 0 : i32
    return %arg1, %c0_i32 : i32, i32
  }
  func.func @transform_2(%arg0: i32, %arg1: i32) -> (i32, i32) {
    %c0_i32 = arith.constant 0 : i32
    %c0_i32_0 = arith.constant 0 : i32
    return %arg0, %c0_i32 : i32, i32
  }
}

</mosaic_0001>

<bundles_post_ra>
// kernel: tpu_custom_call.1
= control target key start
LH: loop header
LB: loop body
LE: loop exit
PB: predicated region body
PF: predicated region fallthrough
CT: control target
= control target key end

     0   :  { %7 = vsyncpa [#allocation3], 0  ;;  %s586_s0 = inlined_call_operand.hbm [shape: bf16[128,128], index: 0, kind: input, shape index: {}]   ;;  %s587_s1 = inlined_call_operand.hbm [shape: bf16[128,128], index: 1, kind: input, shape index: {}]   ;;  %s588_s2 = inlined_call_operand.hbm [shape: f32[128,128], index: 2, kind: output, shape index: {}]  }
   0x1   :  { %8 = vsyncpa [#allocation6], 0 }
   0x2   :  { %9 = vsyncpa [#allocation4], 0  ;;  %s528_s9 = smov [#allocation2]   ;;  %s456_s13 = scalar_lea.hbm %s586_s0, 1024 }
   0x3   :  { %s15_s10 = sshll.u32 %s528_s9, 4  ;;  %p457_p0 = scmp.ne.s32.totalorder %s586_s0, %s456_s13  ;;  %s16_s10 = int_to_ptr.vmem [resolvable:$true] %s15_s10 }
   0x4   :  { %p460_p1 = scmp.lt.u32.totalorder %s456_s13, %s586_s0 }
   0x6   :  { %p462_p2 = pnand %p460_p1, %p457_p0 }
   0x8   :  { %465 = shalt.err (!%p462_p2)
}
   0x9   :  { %s466_s18 = scalar_lea.vmem %s16_s10, 1024  ;;  %p471_p4 = scmp.lt.s32.totalorder %s16_s10, %s16_s10 }
   0xa   :  { %p467_p3 = scmp.ne.s32.totalorder %s16_s10, %s466_s18  ;;  %p472_p5 = scmp.lt.s32.totalorder %s466_s18, %s466_s18 }
   0xc   :  { %p473_p6 = por %p472_p5, %p471_p4 }
   0xe   :  { %p474_p7 = pnand %p473_p6, %p467_p3 }
  0x10   :  { %477 = shalt.err (!%p474_p7)
}
  0x11   :  { %s529_s19 = smov 64   ;;  %s530_s20 = smov 4  }
  0x12   :  { %21 = dma.hbm_to_vmem [thread:$0]  %s586_s0, 1024, %s16_s10, [#allocation3], %s529_s19, %s529_s19, %s530_s20  }
  0x13   :  { %s531_s23 = smov [#allocation5]   ;;  %s478_s27 = scalar_lea.hbm %s587_s1, 1024 }
  0x14   :  { %s27_s24 = sshll.u32 %s531_s23, 4  ;;  %p479_p8 = scmp.ne.s32.totalorder %s587_s1, %s478_s27  ;;  %s28_s24 = int_to_ptr.vmem [resolvable:$true] %s27_s24 }
  0x15   :  { %p482_p9 = scmp.lt.u32.totalorder %s478_s27, %s587_s1 }
  0x17   :  { %p484_p10 = pnand %p482_p9, %p479_p8 }
  0x19   :  { %487 = shalt.err (!%p484_p10)
}
  0x1a   :  { %s488_s4 = scalar_lea.vmem %s28_s24, 1024  ;;  %p493_p12 = scmp.lt.s32.totalorder %s28_s24, %s28_s24 }
  0x1b   :  { %p489_p11 = scmp.ne.s32.totalorder %s28_s24, %s488_s4  ;;  %p494_p13 = scmp.lt.s32.totalorder %s488_s4, %s488_s4 }
  0x1d   :  { %p495_p0 = por %p494_p13, %p493_p12 }
  0x1f   :  { %p496_p1 = pnand %p495_p0, %p489_p11 }
  0x21   :  { %499 = shalt.err (!%p496_p1)
}
  0x22   :  { %33 = dma.hbm_to_vmem [thread:$0]  %s587_s1, 1024, %s28_s24, [#allocation6], %s529_s19, %s529_s19, %s530_s20  }
  0x23   :  { %522 = dma.done.wait [#allocation3], 1024  }
  0x24   :  { %523 = vsyncadd [#allocation3], 4294966272 }
  0x25   :  { %524 = dma.done.wait [#allocation6], 1024  }
  0x26   :  { %525 = vsyncadd [#allocation6], 4294966272  ;;  %v440_v0 = vld [vmem:[#allocation5] sm:$0xff]   ;;  %v441_v1 = vld [vmem:[#allocation5 + $0x8] sm:$0xff]   ;;  %s532_s1 = smov [#allocation7]  }
  0x27   :  { %384 = vmatprep.subr.bf16.mxu0 %v440_v0  ;;  %416 = vmatprep.subr.bf16.mxu1 %v440_v0  ;;  %v442_v2 = vld [vmem:[#allocation5 + $0x10] sm:$0xff]   ;;  %v443_v3 = vld [vmem:[#allocation5 + $0x18] sm:$0xff]   ;;  %v448_v4 = vld [vmem:[#allocation2] sm:$0xff]   ;;  %s339_s6 = sshll.u32 %s532_s1, 4  ;;  %s340_s6 = int_to_ptr.vmem [resolvable:$true] %s339_s6 }
  0x28   :  { %385 = vmatpush3.bf16.msra.mxu0 %v440_v0  ;;  %424 = vmatpush3.bf16.msra.mxu1 %v440_v0  ;;  %v449_v5 = vld [vmem:[#allocation2 + $0x20] sm:$0xff]   ;;  %v445_v7 = vld [vmem:[#allocation5 + $0x28] sm:$0xff]   ;;  %v446_v8 = vld [vmem:[#allocation5 + $0x30] sm:$0xff]   ;;  %s500_s7 = scalar_lea.vmem %s340_s6, 2048  ;;  %p505_p3 = scmp.lt.s32.totalorder %s340_s6, %s340_s6 }
  0x29   :  { %386 = vmatprep.subr.bf16.mxu0 %v441_v1  ;;  %417 = vmatprep.subr.bf16.mxu1 %v441_v1  ;;  %v444_v6 = vld [vmem:[#allocation5 + $0x20] sm:$0xff]   ;;  %v447_v9 = vld [vmem:[#allocation5 + $0x38] sm:$0xff]   ;;  %v450_v10 = vld [vmem:[#allocation2 + $0x8] sm:$0xff]   ;;  %p501_p2 = scmp.ne.s32.totalorder %s340_s6, %s500_s7  ;;  %p506_p4 = scmp.lt.s32.totalorder %s500_s7, %s500_s7 }
  0x2a   :  { %400 = vmatprep.mubr.bf16.mxu0 %v448_v4  ;;  %408 = vmatprep.mubr.bf16.mxu1 %v449_v5  ;;  %v451_v11 = vld [vmem:[#allocation2 + $0x28] sm:$0xff]   ;;  %v452_v12 = vld [vmem:[#allocation2 + $0x10] sm:$0xff]   ;;  %v454_v14 = vld [vmem:[#allocation2 + $0x18] sm:$0xff]  }
  0x2b   :  { %v453_v13 = vld [vmem:[#allocation2 + $0x30] sm:$0xff]   ;;  %v455_v15 = vld [vmem:[#allocation2 + $0x38] sm:$0xff]   ;;  %p507_p5 = por %p506_p4, %p505_p3 }
  0x2c   :  { %387 = vmatpush3.bf16.msra.mxu0 %v441_v1  ;;  %425 = vmatpush3.bf16.msra.mxu1 %v441_v1 }
  0x2d   :  { %388 = vmatprep.subr.bf16.mxu0 %v442_v2  ;;  %418 = vmatprep.subr.bf16.mxu1 %v442_v2  ;;  %p508_p6 = pnand %p507_p5, %p501_p2 }
  0x30   :  { %389 = vmatpush3.bf16.msra.mxu0 %v442_v2  ;;  %426 = vmatpush3.bf16.msra.mxu1 %v442_v2 }
  0x31   :  { %390 = vmatprep.subr.bf16.mxu0 %v443_v3  ;;  %419 = vmatprep.subr.bf16.mxu1 %v443_v3 }
  0x34   :  { %391 = vmatpush3.bf16.msra.mxu0 %v443_v3  ;;  %427 = vmatpush3.bf16.msra.mxu1 %v443_v3 }
  0x35   :  { %392 = vmatprep.subr.bf16.mxu0 %v444_v6  ;;  %420 = vmatprep.subr.bf16.mxu1 %v444_v6 }
  0x38   :  { %393 = vmatpush3.bf16.msra.mxu0 %v444_v6  ;;  %428 = vmatpush3.bf16.msra.mxu1 %v444_v6 }
  0x39   :  { %394 = vmatprep.subr.bf16.mxu0 %v445_v7  ;;  %421 = vmatprep.subr.bf16.mxu1 %v445_v7 }
  0x3c   :  { %395 = vmatpush3.bf16.msra.mxu0 %v445_v7  ;;  %429 = vmatpush3.bf16.msra.mxu1 %v445_v7 }
  0x3d   :  { %396 = vmatprep.subr.bf16.mxu0 %v446_v8  ;;  %422 = vmatprep.subr.bf16.mxu1 %v446_v8 }
  0x40   :  { %397 = vmatpush3.bf16.msra.mxu0 %v446_v8  ;;  %430 = vmatpush3.bf16.msra.mxu1 %v446_v8 }
  0x41   :  { %398 = vmatprep.subr.bf16.mxu0 %v447_v9  ;;  %423 = vmatprep.subr.bf16.mxu1 %v447_v9 }
  0x44   :  { %399 = vmatpush3.bf16.msra.mxu0 %v447_v9  ;;  %431 = vmatpush3.bf16.msra.mxu1 %v447_v9 }
  0x47   :  { %401 = vmatmul.mubr.bf16.vlgmr.msra.gmra.mrb[0].mxu0 %v450_v10  ;;  %409 = vmatmul.mubr.bf16.vlgmr.msra.gmra.mrb[0].mxu1 %v451_v11 }
  0x48   :  { %404 = vmatprep.mubr.bf16.mxu0 %v452_v12  ;;  %412 = vmatprep.mubr.bf16.mxu1 %v453_v13 }
  0x4f   :  { %405 = vmatmul.mubr.bf16.gmra.mrb[4].mxu0 %v454_v14  ;;  %413 = vmatmul.mubr.bf16.gmra.mrb[4].mxu1 %v455_v15 }
 0x11a   :  { %v402_v16 = vpop.f32.mrb[0].mxu0  ;;  %v410_v17 = vpop.f32.mrb[0].mxu1 }
 0x11b   :  { %v239_v18 = vpop.f32.mrb[1].mxu0  ;;  %v271_v19 = vpop.f32.mrb[1].mxu1  ;;  %320 = vst [vmem:[#allocation7 + $0x10] sm:$0xff] %v402_v16  ;;  %328 = vst [vmem:[#allocation7 + $0x50] sm:$0xff] %v410_v17 }
 0x11c   :  { %v403_v20 = vpop.f32.mrb[2].mxu0  ;;  %v411_v21 = vpop.f32.mrb[2].mxu1  ;;  %318 = vst [vmem:[#allocation7] sm:$0xff] %v239_v18  ;;  %326 = vst [vmem:[#allocation7 + $0x40] sm:$0xff] %v271_v19 }
 0x11d   :  { %v242_v22 = vpop.f32.mrb[3].mxu0  ;;  %v274_v23 = vpop.f32.mrb[3].mxu1  ;;  %321 = vst [vmem:[#allocation7 + $0x18] sm:$0xff] %v403_v20  ;;  %329 = vst [vmem:[#allocation7 + $0x58] sm:$0xff] %v411_v21 }
 0x11e   :  { %319 = vst [vmem:[#allocation7 + $0x8] sm:$0xff] %v242_v22  ;;  %327 = vst [vmem:[#allocation7 + $0x48] sm:$0xff] %v274_v23 }
 0x122   :  { %v406_v24 = vpop.f32.mrb[4].mxu0  ;;  %v414_v25 = vpop.f32.mrb[4].mxu1 }
 0x123   :  { %v255_v26 = vpop.f32.mrb[5].mxu0  ;;  %v287_v27 = vpop.f32.mrb[5].mxu1  ;;  %324 = vst [vmem:[#allocation7 + $0x30] sm:$0xff] %v406_v24  ;;  %332 = vst [vmem:[#allocation7 + $0x70] sm:$0xff] %v414_v25 }
 0x124   :  { %v407_v28 = vpop.f32.mrb[6].mxu0  ;;  %v415_v29 = vpop.f32.mrb[6].mxu1  ;;  %322 = vst [vmem:[#allocation7 + $0x20] sm:$0xff] %v255_v26  ;;  %330 = vst [vmem:[#allocation7 + $0x60] sm:$0xff] %v287_v27 }
 0x125   :  { %v258_v30 = vpop.f32.mrb[7].mxu0  ;;  %v290_v31 = vpop.f32.mrb[7].mxu1  ;;  %325 = vst [vmem:[#allocation7 + $0x38] sm:$0xff] %v407_v28  ;;  %333 = vst [vmem:[#allocation7 + $0x78] sm:$0xff] %v415_v29 }
 0x126   :  { %323 = vst [vmem:[#allocation7 + $0x28] sm:$0xff] %v258_v30  ;;  %331 = vst [vmem:[#allocation7 + $0x68] sm:$0xff] %v290_v31 }
 0x127   :  { %511 = shalt.err (!%p508_p6)
}
 0x128   :  { %s512_s10 = scalar_lea.hbm %s588_s2, 2048 }
 0x129   :  { %p513_p7 = scmp.ne.s32.totalorder %s588_s2, %s512_s10  ;;  %p516_p8 = scmp.lt.u32.totalorder %s512_s10, %s588_s2 }
 0x12b   :  { %p518_p9 = pnand %p516_p8, %p513_p7 }
 0x12d   :  { %521 = shalt.err (!%p518_p9)
}
 0x12e   :  { %s533_s15 = smov 128   ;;  %s534_s16 = smov 8  }
 0x12f   :  { %345 = dma.vmem_to_hbm [thread:$0]  %s340_s6, 2048, %s588_s2, [#allocation4], %s533_s15, %s533_s15, %s534_s16  }
 0x130   :  { %526 = dma.done.wait [#allocation4], 2048  }
 0x131   :  { %527 = vsyncadd [#allocation4], 4294965248 }
 0x132   :  { %349 = vsyncpa [#allocation3], 1 }
 0x133   :  { %350 = vsyncpa [#allocation6], 1 }
 0x134   :  { %351 = vsyncpa [#allocation4], 1 }

</bundles_post_ra>
